<compile_context>
chip_gen: v5e
topology: v5e:2x2
jax: 0.10.0
libtpu: 0.0.40
codegen_flags: <defaults>
</compile_context>

<pallas_src>
import math

import jax
import jax.numpy as jnp
from jax.experimental import pallas as pl
from jax.experimental.pallas import tpu as pltpu  # noqa: F401  (TPU tuning hooks)

# Synthetic small config (stand-in for config.C_dgm / H_dgm / W_dgm /
# num_classes / num_sampled_images).
N_SAMPLES = 2
C_DGM, H_DGM, W_DGM = 4, 16, 16
NUM_CLASSES = 10

_Z_ROWS = N_SAMPLES * C_DGM      # 8    (sublane-aligned)
_Z_COLS = H_DGM * W_DGM          # 256  (lane-aligned, multiple of 128)
_Y_COLS = 128                    # one lane row of label candidates

_TWO_PI = 2.0 * math.pi

# TODO(synk): forward / loss_fn / _sample / setup_models are abstract in the
# base class (raise NotImplementedError), so there is no forward hot path to
# translate; only sample_prior has concrete semantics.


def _prior_kernel(u1_ref, u2_ref, uy_ref, z_ref, y_ref):
    # Box–Muller: two uniforms in (0,1] x [0,1) -> standard normal
    # (torch.randn equivalent).  log / sqrt / cos run on the EUP slot.
    r = jnp.sqrt(-2.0 * jnp.log(u1_ref[...]))
    z_ref[...] = r * jnp.cos(_TWO_PI * u2_ref[...])

    # Uniform class labels in [0, NUM_CLASSES) (torch.randint equivalent).
    # u < 1.0 exactly by construction, so floor(u * NUM_CLASSES) is already
    # <= NUM_CLASSES - 1; no clamp needed.
    y_ref[...] = jnp.floor(uy_ref[...] * float(NUM_CLASSES)).astype(jnp.int32)


def sample_prior(key: jax.Array):
    """Pallas equivalent of ContinuousTimeDGM.sample_prior.

    Args:
      key: jax.random PRNG key (deterministic source of randomness).

    Returns:
      z0: float32 (N, C, H, W) standard-normal noise (NCHW, like PyTorch).
      y : int32   (N,) class labels in [0, NUM_CLASSES).
    """
    k1, k2, k3 = jax.random.split(key, 3)
    tiny = jnp.finfo(jnp.float32).tiny
    # u1 in (0, 1] so log(u1) is finite; u2, uy in [0, 1).
    u1 = jax.random.uniform(k1, (_Z_ROWS, _Z_COLS), jnp.float32,
                            minval=tiny, maxval=1.0)
    u2 = jax.random.uniform(k2, (_Z_ROWS, _Z_COLS), jnp.float32)
    uy = jax.random.uniform(k3, (1, _Y_COLS), jnp.float32)

    # Single no-grid pallas_call: full arrays mapped straight into VMEM, no
    # pipeline / scalar-prefetch scaffolding (the whole workload is ~12 KiB).
    z_flat, y_pad = pl.pallas_call(
        _prior_kernel,
        out_shape=(
            jax.ShapeDtypeStruct((_Z_ROWS, _Z_COLS), jnp.float32),
            jax.ShapeDtypeStruct((1, _Y_COLS), jnp.int32),
        ),
    )(u1, u2, uy)

    z0 = z_flat.reshape(N_SAMPLES, C_DGM, H_DGM, W_DGM)
    y = y_pad[0, :N_SAMPLES]
    return z0, y


if __name__ == "__main__":
    key = jax.random.PRNGKey(0)

    z0, y = sample_prior(key)
    jax.block_until_ready((z0, y))

    assert z0.shape == (N_SAMPLES, C_DGM, H_DGM, W_DGM), z0.shape
    assert z0.dtype == jnp.float32, z0.dtype
    assert y.shape == (N_SAMPLES,), y.shape
    assert y.dtype == jnp.int32, y.dtype
    assert bool(jnp.all((y >= 0) & (y < NUM_CLASSES)))
    assert bool(jnp.all(jnp.isfinite(z0)))
    # Sanity: noise is roughly zero-mean / unit-variance over 2048 samples.
    assert abs(float(z0.mean())) < 0.5 and 0.5 < float(z0.std()) < 1.5

    print("KERNEL_OK")
</pallas_src>

<mosaic_0001>
module attributes {stable_mosaic.version = 11 : i64} {
  func.func @_prior_kernel(%arg0: memref<8x256xf32, #tpu.memory_space<vmem>>, %arg1: memref<8x256xf32, #tpu.memory_space<vmem>>, %arg2: memref<1x128xf32, #tpu.memory_space<vmem>>, %arg3: memref<8x256xf32, #tpu.memory_space<vmem>>, %arg4: memref<1x128xi32, #tpu.memory_space<vmem>>) attributes {dimension_semantics = [], scalar_prefetch = 0 : i64, scratch_operands = 0 : i64, tpu.core_type = #tpu.core_type<tc>} {
    %c0 = arith.constant 0 : index
    %c0_0 = arith.constant 0 : index
    %0 = vector.load %arg0[%c0, %c0_0] : memref<8x256xf32, #tpu.memory_space<vmem>>, vector<8x256xf32>
    %1 = math.log %0 : vector<8x256xf32>
    %cst = arith.constant -2.000000e+00 : f32
    %2 = vector.broadcast %cst : f32 to vector<8x256xf32>
    %3 = arith.mulf %2, %1 : vector<8x256xf32>
    %4 = math.sqrt %3 : vector<8x256xf32>
    %c0_1 = arith.constant 0 : index
    %c0_2 = arith.constant 0 : index
    %5 = vector.load %arg1[%c0_1, %c0_2] : memref<8x256xf32, #tpu.memory_space<vmem>>, vector<8x256xf32>
    %cst_3 = arith.constant 6.28318548 : f32
    %6 = vector.broadcast %cst_3 : f32 to vector<8x256xf32>
    %7 = arith.mulf %6, %5 : vector<8x256xf32>
    %8 = math.cos %7 : vector<8x256xf32>
    %9 = arith.mulf %4, %8 : vector<8x256xf32>
    %c0_4 = arith.constant 0 : index
    %c0_5 = arith.constant 0 : index
    %10 = vector.load %arg3[%c0_4, %c0_5] : memref<8x256xf32, #tpu.memory_space<vmem>>, vector<8x256xf32>
    tpu.vector_store %arg3[%c0_4, %c0_5], %9 {strides = array<i32>} : memref<8x256xf32, #tpu.memory_space<vmem>>, vector<8x256xf32>,
    %c0_6 = arith.constant 0 : index
    %c0_7 = arith.constant 0 : index
    %11 = vector.load %arg2[%c0_6, %c0_7] : memref<1x128xf32, #tpu.memory_space<vmem>>, vector<1x128xf32>
    %cst_8 = arith.constant 1.000000e+01 : f32
    %12 = vector.broadcast %cst_8 : f32 to vector<1x128xf32>
    %13 = arith.mulf %11, %12 : vector<1x128xf32>
    %14 = math.floor %13 : vector<1x128xf32>
    %15 = arith.fptosi %14 : vector<1x128xf32> to vector<1x128xi32>
    %c0_9 = arith.constant 0 : index
    %c0_10 = arith.constant 0 : index
    %16 = vector.load %arg4[%c0_9, %c0_10] : memref<1x128xi32, #tpu.memory_space<vmem>>, vector<1x128xi32>
    tpu.vector_store %arg4[%c0_9, %c0_10], %15 {strides = array<i32>} : memref<1x128xi32, #tpu.memory_space<vmem>>, vector<1x128xi32>,
    return
  }
}

</mosaic_0001>

<bundles_post_ra>
// kernel: tpu_custom_call.1
= control target key start
LH: loop header
LB: loop body
LE: loop exit
PB: predicated region body
PF: predicated region fallthrough
CT: control target
= control target key end

     0   :  { %10 = vsyncpa [#allocation3], 0  ;;  %s804_s0 = inlined_call_operand.hbm [shape: f32[8,256], index: 0, kind: input, shape index: {}]   ;;  %s805_s1 = inlined_call_operand.hbm [shape: f32[8,256], index: 1, kind: input, shape index: {}]   ;;  %s806_s2 = inlined_call_operand.vmem [shape: f32[1,128], index: 2, kind: input, shape index: {}]   ;;  %s807_s3 = inlined_call_operand.hbm [shape: f32[8,256], index: 3, kind: output, shape index: {0}]   ;;  %s808_s4 = inlined_call_operand.hbm [shape: s32[1,128], index: 4, kind: output, shape index: {1}]  }
   0x1   :  { %11 = vsyncpa [#allocation6], 0 }
   0x2   :  { %12 = vsyncpa [#allocation4], 0 }
   0x3   :  { %13 = vsyncpa [#allocation9], 0  ;;  %s19_s17 = sshll.u32 %s804_s0, 4  ;;  %s564_s18 = smov [#allocation2]   ;;  %s20_s17 = int_to_ptr.hbm [resolvable:$true] %s19_s17 }
   0x4   :  { %s21_s19 = sshll.u32 %s564_s18, 4  ;;  %s30_s22 = sshll.u32 %s805_s1, 4  ;;  %s22_s19 = int_to_ptr.vmem [resolvable:$true] %s21_s19  ;;  %s31_s22 = int_to_ptr.hbm [resolvable:$true] %s30_s22 }
   0x5   :  { %24 = dma.hbm_to_vmem [thread:$0]  %s20_s17, 256, %s22_s19, [#allocation3]  }
   0x6   :  { %s565_s23 = smov [#allocation5]  }
   0x7   :  { %s32_s24 = sshll.u32 %s565_s23, 4  ;;  %s33_s24 = int_to_ptr.vmem [resolvable:$true] %s32_s24 }
   0x8   :  { %35 = dma.hbm_to_vmem [thread:$0]  %s31_s22, 256, %s33_s24, [#allocation6]  }
   0x9   :  { %556 = dma.done.wait [#allocation3], 256  }
   0xa   :  { %557 = vsyncadd [#allocation3], 4294967040 }
   0xb   :  { %558 = dma.done.wait [#allocation6], 256  }
   0xc   :  { %559 = vsyncadd [#allocation6], 4294967040  ;;  %v78_v0 = vld [vmem:[#allocation5] sm:$0xff]  ;;  %v79_v1 = vld [vmem:[#allocation5 + $0x8] sm:$0xff]  ;;  %v566_v21 = vmov 683565275  }
   0xd   :  { %v606_v2 = vmul.f32 6.2831855, %v78_v0  ;;  %v608_v3 = vmul.f32 6.2831855, %v79_v1  ;;  %v567_v23 = vmov 2475754826  }
   0xe   :  { %v568_v25 = vmov 2131351028   ;;  %v569_v27 = vmov 2102212464   ;;  %v570_v29 = vmov 920167782  }
   0xf   :  { %v85_v4 = vand.u32 2139095040, %v606_v2  ;;  %v239_v5 = vand.u32 2139095040, %v608_v3  ;;  %v82_v7 = vand.u32 2147483647, %v606_v2  ;;  %v236_v15 = vand.u32 2147483647, %v608_v3 }
  0x10   :  { %v571_v37 = vmov 1326507024   ;;  %s573_s25 = smov [#allocation8]   ;;  %s417_s29 = sshll.u32 %s808_s4, 4  ;;  %s418_s29 = int_to_ptr.hbm [resolvable:$true] %s417_s29 }
  0x11   :  { %v86_v6 = vshrl.u32 %v85_v4, 23  ;;  %v240_v8 = vshrl.u32 %v239_v5, 23  ;;  %v89_v12 = vand.u32 8388607, %v82_v7  ;;  %v622_v31 = vand.u32 8388607, %v236_v15 }
  0x12   :  { %s415_s26 = sshll.u32 %s573_s25, 4  ;;  %s406_s6 = sshll.u32 %s807_s3, 4  ;;  %s416_s26 = int_to_ptr.vmem [resolvable:$true] %s415_s26  ;;  %s407_s6 = int_to_ptr.hbm [resolvable:$true] %s406_s6 }
  0x13   :  { %v433_v9 = vadd.s32 4294967169, %v86_v6  ;;  %v436_v10 = vadd.s32 4294967169, %v240_v8  ;;  %v90_v16 = vor.u32 8388608, %v89_v12  ;;  %v244_v0 = vor.u32 8388608, %v622_v31 }
  0x15   :  { %v92_v11 = vadd.s32 1, %v433_v9  ;;  %v246_v13 = vadd.s32 1, %v436_v10  ;;  %v626_v35 = vshll.u32 %v90_v16, 8 }
  0x17   :  { %vm93_vm0 = vcmp.gt.s32.totalorder %v92_v11, 0  ;;  %vm247_vm1 = vcmp.gt.s32.totalorder %v246_v13, 0  ;;  %v131_v51 = vand.u32 65535, %v626_v35  ;;  %v132_v54 = vshrl.u32 %v626_v35, 16 }
  0x18   :  { %v94_v14 = vsel %vm93_vm0, %v92_v11, 0  ;;  %v248_v19 = vsel %vm247_vm1, %v246_v13, 0 }
  0x19   :  { %v96_v17 = vand.u32 31, %v94_v14  ;;  %v95_v18 = vshrl.u32 %v94_v14, 5  ;;  %v630_v39 = vand.u32 31, %v248_v19  ;;  %v644_v1 = vshrl.u32 %v248_v19, 5 }
  0x1b   :  { %v97_v20 = vsub.s32 32, %v96_v17  ;;  %v99_v22 = vshll.u32 %v566_v21, %v96_v17  ;;  %v102_v24 = vshll.u32 %v567_v23, %v96_v17  ;;  %v105_v26 = vshll.u32 %v568_v25, %v96_v17 }
  0x1c   :  { %v108_v28 = vshll.u32 %v569_v27, %v96_v17  ;;  %v111_v30 = vshll.u32 %v570_v29, %v96_v17  ;;  %vm114_vm2 = vcmp.lt.s32.totalorder %v95_v18, 1  ;;  %vm117_vm3 = vcmp.lt.s32.totalorder %v95_v18, 4 }
  0x1d   :  { %v100_v32 = vshrl.u32 %v567_v23, %v97_v20  ;;  %v103_v33 = vshrl.u32 %v568_v25, %v97_v20  ;;  %v106_v34 = vshrl.u32 %v569_v27, %v97_v20  ;;  %v109_v36 = vshrl.u32 %v570_v29, %v97_v20 }
  0x1e   :  { %v112_v38 = vshrl.u32 %v571_v37, %v97_v20  ;;  %v98_v43 = vshrl.u32 %v566_v21, %v97_v20  ;;  %vm116_vm4 = vcmp.lt.s32.totalorder %v95_v18, 3  ;;  %vm115_vm5 = vcmp.lt.s32.totalorder %v95_v18, 2 }
  0x1f   :  { %v101_v40 = vor.u32 %v100_v32, %v99_v22  ;;  %v104_v41 = vor.u32 %v103_v33, %v102_v24  ;;  %v107_v42 = vor.u32 %v106_v34, %v105_v26  ;;  %v110_v44 = vor.u32 %v109_v36, %v108_v28 }
  0x20   :  { %v113_v45 = vor.u32 %v112_v38, %v111_v30  ;;  %v638_v55 = vsub.s32 32, %v630_v39  ;;  %v253_v12 = vshll.u32 %v566_v21, %v630_v39  ;;  %v256_v18 = vshll.u32 %v567_v23, %v630_v39 }
  0x21   :  { %v119_v46 = vsel %vm117_vm3, %v107_v42, 2102212464  ;;  %v122_v47 = vsel %vm114_vm2, %v101_v40, %v104_v41  ;;  %v126_v48 = vsel %vm114_vm2, %v104_v41, %v107_v42  ;;  %v123_v49 = vsel %vm117_vm3, %v110_v44, 920167782 }
  0x22   :  { %v127_v50 = vsel %vm117_vm3, %v113_v45, 1326507024  ;;  %v124_v52 = vsel %vm116_vm4, %v107_v42, %v123_v49  ;;  %v118_v56 = vsel %vm114_vm2, %v98_v43, %v101_v40  ;;  %v120_v57 = vsel %vm116_vm4, %v104_v41, %v119_v46 }
  0x23   :  { %v128_v53 = vsel %vm116_vm4, %v110_v44, %v127_v50  ;;  %v125_v58 = vsel %vm115_vm5, %v122_v47, %v124_v52  ;;  %v647_v4 = vsel %vm115_vm5, %v118_v56, %v120_v57  ;;  %v254_v17 = vshrl.u32 %v567_v23, %v638_v55 }
  0x24   :  { %v129_v59 = vsel %vm115_vm5, %v126_v48, %v128_v53  ;;  %v155_v62 = vand.u32 65535, %v125_v58  ;;  %v156_v63 = vshrl.u32 %v125_v58, 16  ;;  %v572_v30 = vmov 0   ;;  %v46_v58 = vld [vmem:[#allocation2] sm:$0xff] }
  0x25   :  { %v133_v60 = vand.u32 65535, %v129_v59  ;;  %v134_v61 = vshrl.u32 %v129_v59, 16  ;;  %v656_v23 = vor.u32 %v254_v17, %v253_v12  ;;  %v257_v44 = vshrl.u32 %v568_v25, %v638_v55 }
  0x26   :  { %v157_v9 = vmul.u32 %v155_v62, %v131_v51  ;;  %v158_v10 = vmul.u32 %v156_v63, %v131_v51  ;;  %v159_v11 = vmul.u32 %v155_v62, %v132_v54  ;;  %v160_v19 = vmul.u32 %v156_v63, %v132_v54 }
  0x27   :  { %v135_v5 = vmul.u32 %v133_v60, %v131_v51  ;;  %v136_v6 = vmul.u32 %v134_v61, %v131_v51  ;;  %v137_v8 = vmul.u32 %v133_v60, %v132_v54  ;;  %v138_v13 = vmul.u32 %v134_v61, %v132_v54 }
  0x28   :  { %v161_v22 = vshll.u32 %v158_v10, 16  ;;  %v163_v28 = vshll.u32 %v159_v11, 16  ;;  %v162_v32 = vshrl.u32 %v158_v10, 16  ;;  %v164_v36 = vshrl.u32 %v159_v11, 16 }
  0x29   :  { %v139_v14 = vshll.u32 %v136_v6, 16  ;;  %v141_v16 = vshll.u32 %v137_v8, 16  ;;  %v140_v20 = vshrl.u32 %v136_v6, 16  ;;  %v142_v24 = vshrl.u32 %v137_v8, 16 }
  0x2a   :  { %vm165_vm7 = vc.u32 %v157_v9, %v161_v22  ;;  %v167_v33 = vadd.s32 %v161_v22, %v157_v9  ;;  %v259_v45 = vshll.u32 %v568_v25, %v630_v39  ;;  %v260_v47 = vshrl.u32 %v569_v27, %v638_v55 }
  0x2b   :  { %vm143_vm6 = vc.u32 %v135_v5, %v139_v14  ;;  %v145_v26 = vadd.s32 %v139_v14, %v135_v5  ;;  %v166_v38 = vsel %vm165_vm7, 1, %v572_v30  ;;  %v262_v48 = vshll.u32 %v569_v27, %v630_v39 }
  0x2c   :  { %v144_v31 = vsel %vm143_vm6, 1, %v572_v30  ;;  %v168_v41 = vadd.s32 %v166_v38, %v160_v19  ;;  %vm169_vm9 = vc.u32 %v167_v33, %v163_v28  ;;  %v263_v49 = vshrl.u32 %v570_v29, %v638_v55 }
  0x2d   :  { %v146_v34 = vadd.s32 %v144_v31, %v138_v13  ;;  %vm147_vm8 = vc.u32 %v145_v26, %v141_v16  ;;  %v170_v43 = vsel %vm169_vm9, 1, %v572_v30  ;;  %v669_v51 = vadd.s32 %v167_v33, %v163_v28 }
  0x2e   :  { %v148_v40 = vsel %vm147_vm8, 1, %v572_v30  ;;  %v172_v46 = vadd.s32 %v170_v43, %v168_v41  ;;  %v671_v52 = vor.u32 %v257_v44, %v256_v18  ;;  %v265_v53 = vshll.u32 %v570_v29, %v630_v39 }
  0x2f   :  { %v150_v42 = vadd.s32 %v148_v40, %v146_v34  ;;  %v675_v25 = vor.u32 %v260_v47, %v259_v45  ;;  %v264_v56 = vor.u32 %v263_v49, %v262_v48  ;;  %v266_v57 = vshrl.u32 %v571_v37, %v638_v55 }
  0x30   :  { %v173_v54 = vadd.s32 %v172_v46, %v162_v32  ;;  %vm268_vm10 = vcmp.lt.s32.totalorder %v644_v1, 1  ;;  %v682_v59 = vshll.u32 %v244_v0, 8  ;;  %vm270_vm11 = vcmp.lt.s32.totalorder %v644_v1, 3 }
  0x31   :  { %v151_v50 = vadd.s32 %v150_v42, %v140_v20  ;;  %v267_v61 = vor.u32 %v266_v57, %v265_v53  ;;  %vm271_vm12 = vcmp.lt.s32.totalorder %v644_v1, 4  ;;  %v175_v29 = vmul.u32 %v626_v35, %v647_v4 }
  0x32   :  { %v174_v60 = vadd.s32 %v173_v54, %v164_v36  ;;  %vm269_vm14 = vcmp.lt.s32.totalorder %v644_v1, 2  ;;  %v276_v37 = vsel %vm268_vm10, %v656_v23, %v671_v52  ;;  %452 = vlog2.f32 %v46_v58 }
  0x33   :  { %v679_v27 = vadd.s32 %v151_v50, %v142_v24  ;;  %v277_v62 = vsel %vm271_vm12, %v264_v56, 920167782  ;;  %v280_v35 = vsel %vm268_vm10, %v671_v52, %v675_v25  ;;  %v281_v0 = vsel %vm271_vm12, %v267_v61, 1326507024 }
  0x34   :  { %v178_v39 = vadd.s32 1, %v174_v60  ;;  %v278_v63 = vsel %vm270_vm11, %v675_v25, %v277_v62  ;;  %v285_v4 = vand.u32 65535, %v682_v59  ;;  %v282_v8 = vsel %vm270_vm11, %v264_v56, %v281_v0 }
  0x35   :  { %vm177_vm13 = vc.u32 %v679_v27, %v669_v51  ;;  %v279_v6 = vsel %vm269_vm14, %v276_v37, %v278_v63  ;;  %v286_v9 = vshrl.u32 %v682_v59, 16  ;;  %v283_v11 = vsel %vm269_vm14, %v280_v35, %v282_v8 }
  0x36   :  { %v179_v5 = vsel %vm177_vm13, %v178_v39, %v174_v60  ;;  %v309_v12 = vand.u32 65535, %v279_v6  ;;  %v287_v13 = vand.u32 65535, %v283_v11  ;;  %v288_v14 = vshrl.u32 %v283_v11, 16 }
  0x37   :  { %v180_v10 = vadd.s32 %v179_v5, %v175_v29  ;;  %v310_v17 = vshrl.u32 %v279_v6, 16  ;;  %v252_v54 = vshrl.u32 %v566_v21, %v638_v55  ;;  %v273_v61 = vsel %vm271_vm12, %v675_v25, 2102212464 }
  0x38   :  { %v453_v20 = vpop.eup %452  ;;  %v289_v19 = vmul.u32 %v287_v13, %v285_v4  ;;  %v290_v22 = vmul.u32 %v288_v14, %v285_v4  ;;  %v291_v18 = vmul.u32 %v287_v13, %v286_v9  ;;  %v311_v26 = vmul.u32 %v309_v12, %v285_v4 }
  0x39   :  { %v181_v16 = vadd.s32 536870912, %v180_v10  ;;  %v312_v28 = vmul.u32 %v310_v17, %v285_v4  ;;  %v292_v31 = vmul.u32 %v288_v14, %v286_v9  ;;  %v313_v34 = vmul.u32 %v309_v12, %v286_v9 }
  0x3a   :  { %v293_v32 = vshll.u32 %v290_v22, 16  ;;  %v295_v33 = vshll.u32 %v291_v18, 16  ;;  %v49_v36 = vmul.f32 0.6931472, %v453_v20  ;;  %v314_v42 = vmul.u32 %v310_v17, %v286_v9 }
  0x3b   :  { %v714_v24 = vshrl.u32 %v181_v16, 30  ;;  %v315_v40 = vshll.u32 %v312_v28, 16  ;;  %v294_v44 = vshrl.u32 %v290_v22, 16  ;;  %v317_v47 = vshll.u32 %v313_v34, 16 }
  0x3c   :  { %vm297_vm15 = vc.u32 %v289_v19, %v293_v32  ;;  %v299_v41 = vadd.s32 %v293_v32, %v289_v19  ;;  %v719_v49 = vmul.f32 -2.0, %v49_v36  ;;  %v296_v29 = vshrl.u32 %v291_v18, 16 }
  0x3d   :  { %v183_v38 = vshll.u32 %v714_v24, 30  ;;  %v298_v45 = vsel %vm297_vm15, 1, %v572_v30  ;;  %vm319_vm0 = vc.u32 %v311_v26, %v315_v40  ;;  %v321_v57 = vadd.s32 %v315_v40, %v311_v26 }
  0x3e   :  { %v300_v46 = vadd.s32 %v298_v45, %v292_v31  ;;  %vm301_vm1 = vc.u32 %v299_v41, %v295_v33  ;;  %v320_v48 = vsel %vm319_vm0, 1, %v572_v30  ;;  %v316_v62 = vshrl.u32 %v312_v28, 16 }
  0x3f   :  { %v184_v43 = vsub.s32 %v180_v10, %v183_v38  ;;  %v302_v53 = vsel %vm301_vm1, 1, %v572_v30  ;;  %v322_v58 = vadd.s32 %v320_v48, %v314_v42  ;;  %vm323_vm3 = vc.u32 %v321_v57, %v317_v47 }
  0x40   :  { %v304_v56 = vadd.s32 %v302_v53, %v300_v46  ;;  %454 = vrsqrt.f32 %v719_v49  ;;  %v324_v35 = vsel %vm323_vm3, 1, %v572_v30  ;;  %v272_v21 = vsel %vm268_vm10, %v252_v54, %v656_v23 }
  0x41   :  { %vm185_vm2 = vcmp.lt.s32.totalorder %v184_v43, 0  ;;  %v186_v50 = vsub.s32 0, %v184_v43  ;;  %v274_v55 = vsel %vm270_vm11, %v671_v52, %v273_v61  ;;  %v326_v0 = vadd.s32 %v324_v35, %v322_v58 }
  0x42   :  { %v305_v39 = vadd.s32 %v304_v56, %v294_v44  ;;  %v176_v25 = vadd.s32 %v669_v51, %v679_v27  ;;  %v318_v4 = vshrl.u32 %v313_v34, 16  ;;  %v325_v6 = vadd.s32 %v321_v57, %v317_v47  ;;  %v47_v51 = vld [vmem:[#allocation2 + $0x8] sm:$0xff] }
  0x43   :  { %v187_v60 = vsel %vm185_vm2, %v186_v50, %v184_v43  ;;  %v327_v8 = vadd.s32 %v326_v0, %v316_v62  ;;  %v275_v30 = vsel %vm269_vm14, %v272_v21, %v274_v55  ;;  %456 = vlog2.f32 %v47_v51 }
  0x44   :  { %v188_v37 = vclz %v187_v60  ;;  %v306_v5 = vadd.s32 %v305_v39, %v296_v29  ;;  %v329_v16 = vmul.u32 %v682_v59, %v275_v30  ;;  %vm84_vm6 = vcmp.lt.s32.totalorder %v606_v2, 0 }
  0x45   :  { %v328_v13 = vadd.s32 %v327_v8, %v318_v4  ;;  %vm746_vm7 = vcmp.le.f32.partialorder %v82_v7, 0.7853982  ;;  %v206_v44 = vsub.s32 4, %v714_v24  ;;  %vm61_vm10 = vcmp.eq.f32.partialorder %v719_v49, inf }
  0x46   :  { %v434_v63 = vadd.s32 4294967294, %v188_v37  ;;  %v455_v12 = vpop.eup %454  ;;  %vm331_vm5 = vc.u32 %v306_v5, %v325_v6  ;;  %vm63_vm11 = vcmp.eq.f32.partialorder %v719_v49, 0.0  ;;  %vm225_vm15 = vweird.f32 %v606_v2 }
  0x47   :  { %v332_v27 = vadd.s32 1, %v328_v13  ;;  %v55_v19 = vmul.f32 %v455_v12, %v719_v49  ;;  %v207_v56 = vsel %vm84_vm6, %v206_v44, %v714_v24  ;;  %vm238_vm0 = vcmp.lt.s32.totalorder %v608_v3, 0 }
  0x48   :  { %vm435_vm4 = vcmp.lt.s32.totalorder %v434_v63, 0  ;;  %v209_v39 = vsel %vm746_vm7, 0, %v207_v56  ;;  %vm784_vm1 = vcmp.le.f32.partialorder %v236_v15, 0.7853982 }
  0x49   :  { %v191_v9 = vsel %vm435_vm4, 0, %v434_v63  ;;  %v333_v22 = vsel %vm331_vm5, %v332_v27, %v328_v13  ;;  %v56_v32 = vmul.f32 %v455_v12, %v55_v19  ;;  %v457_v59 = vpop.eup %456  ;;  %v330_v63 = vadd.s32 %v325_v6, %v306_v5 }
  0x4a   :  { %v192_v10 = vsub.s32 32, %v191_v9  ;;  %v193_v11 = vshll.u32 %v184_v43, %v191_v9  ;;  %v196_v23 = vsub.s32 4294967266, %v191_v9  ;;  %v334_v26 = vadd.s32 %v333_v22, %v329_v16  ;;  %v394_v9 = vld [vmem:[%s806_s2] sm:$0x1]  ;;  %s574_s2 = smov [#allocation7]  }
  0x4b   :  { %v57_v41 = vmul.f32 0.5, %v56_v32  ;;  %v51_v46 = vmul.f32 0.6931472, %v457_v59  ;;  %v226_v24 = vand.u32 3, %v209_v39  ;;  %v395_v6 = vmul.f32 10.0, %v394_v9  ;;  %s404_s4 = sshll.u32 %s574_s2, 4  ;;  %s405_s4 = int_to_ptr.vmem [resolvable:$true] %s404_s4 }
  0x4c   :  { %v194_v14 = vshrl.u32 %v176_v25, %v192_v10  ;;  %v197_v52 = vadd.s32 127, %v196_v23  ;;  %v335_v31 = vadd.s32 536870912, %v334_v26 }
  0x4d   :  { %v58_v48 = vsub.f32 1.5, %v57_v41  ;;  %v760_v57 = vmul.f32 -2.0, %v51_v46  ;;  %vm231_vm12 = vcmp.eq.s32.totalorder %v226_v24, 2  ;;  %v396_v51 = vfloor.f32 %v395_v6 }
  0x4e   :  { %v195_v17 = vor.u32 %v194_v14, %v193_v11  ;;  %v198_v20 = vshll.u32 %v197_v52, 23  ;;  %v741_v34 = vshrl.u32 %v335_v31, 30  ;;  %vm228_vm13 = vcmp.eq.s32.totalorder %v226_v24, 0 }
  0x4f   :  { %v59_v37 = vmul.f32 %v455_v12, %v58_v48  ;;  %458 = vrsqrt.f32 %v760_v57  ;;  %vm227_vm14 = vcmp.lt.s32.totalorder %v226_v24, 2  ;;  %vm73_vm2 = vcmp.eq.f32.partialorder %v760_v57, inf }
  0x50   :  { %v199_v18 = vor.u32 4788187, %v198_v20  ;;  %v202_v1 = vcvt.s32.f32 %v195_v17  ;;  %v337_v40 = vshll.u32 %v741_v34, 30  ;;  %v64_v17 = vand.u32 2147483648, %v719_v49 }
  0x51   :  { %v60_v30 = vmul.f32 %v59_v37, %v719_v49  ;;  %vm75_vm4 = vcmp.eq.f32.partialorder %v760_v57, 0.0 }
  0x52   :  { %v200_v28 = vand.u32 2147483647, %v199_v18  ;;  %v338_v43 = vsub.s32 %v334_v26, %v337_v40 }
  0x53   :  { %v62_v27 = vsel %vm61_vm10, %v719_v49, %v60_v30 }
  0x54   :  { %v203_v33 = vmul.f32 %v202_v1, %v200_v28  ;;  %vm339_vm8 = vcmp.lt.s32.totalorder %v338_v43, 0  ;;  %v340_v7 = vsub.s32 0, %v338_v43  ;;  %v440_v1 = vcvt.f32.s32 %v396_v51 }
  0x55   :  { %v459_v14 = vpop.eup %458 }
  0x56   :  { %v204_v38 = vxor.u32 2147483648, %v203_v33  ;;  %v341_v54 = vsel %vm339_vm8, %v340_v7, %v338_v43  ;;  %v67_v31 = vmul.f32 %v459_v14, %v760_v57  ;;  %398 = vst [vmem:[#allocation8] sm:$0x1] %v440_v1 }
  0x57   :  { %v342_v58 = vclz %v341_v54  ;;  %420 = dma.vmem_to_hbm [thread:$0]  %s416_s26, 16, %s418_s29, [#allocation9]  }
  0x58   :  { %v205_v42 = vsel %vm84_vm6, %v204_v38, %v203_v33  ;;  %v65_v33 = vsel %vm63_vm11, %v64_v17, %v62_v27  ;;  %v68_v41 = vmul.f32 %v459_v14, %v67_v31 }
  0x59   :  { %v208_v45 = vsel %vm746_vm7, %v606_v2, %v205_v42  ;;  %v437_v29 = vadd.s32 4294967294, %v342_v58  ;;  %vm379_vm7 = vweird.f32 %v608_v3 }
  0x5a   :  { %v210_v47 = vmul.f32 %v208_v45, %v208_v45  ;;  %v69_v49 = vmul.f32 0.5, %v68_v41 }
  0x5b   :  { %vm438_vm9 = vcmp.lt.s32.totalorder %v437_v29, 0 }
  0x5c   :  { %v211_v50 = vmul.f32 -0.001358992, %v210_v47  ;;  %v218_v53 = vmul.f32 -0.00019511016, %v210_v47  ;;  %v345_v0 = vsel %vm438_vm9, 0, %v437_v29 }
  0x5d   :  { %v346_v25 = vsub.s32 32, %v345_v0  ;;  %v347_v4 = vshll.u32 %v338_v43, %v345_v0  ;;  %v350_v8 = vsub.s32 4294967266, %v345_v0 }
  0x5e   :  { %v212_v60 = vadd.f32 0.041655596, %v211_v50  ;;  %v219_v61 = vadd.f32 0.008332121, %v218_v53  ;;  %v70_v50 = vsub.f32 1.5, %v69_v49 }
  0x5f   :  { %v348_v23 = vshrl.u32 %v330_v63, %v346_v25  ;;  %v351_v5 = vadd.s32 127, %v350_v8 }
  0x60   :  { %v213_v62 = vmul.f32 %v212_v60, %v210_v47  ;;  %v220_v35 = vmul.f32 %v219_v61, %v210_v47  ;;  %v71_v61 = vmul.f32 %v459_v14, %v70_v50 }
  0x61   :  { %v349_v52 = vor.u32 %v348_v23, %v347_v4  ;;  %v352_v16 = vshll.u32 %v351_v5, 23 }
  0x62   :  { %v214_v21 = vadd.f32 -0.4999988, %v213_v62  ;;  %v221_v55 = vadd.f32 -0.16666654, %v220_v35  ;;  %v72_v63 = vmul.f32 %v71_v61, %v760_v57 }
  0x63   :  { %v353_v22 = vor.u32 4788187, %v352_v16  ;;  %v356_v18 = vcvt.s32.f32 %v349_v52 }
  0x64   :  { %v215_v10 = vmul.f32 %v214_v21, %v210_v47  ;;  %v222_v11 = vmul.f32 %v221_v55, %v210_v47  ;;  %v74_v25 = vsel %vm73_vm2, %v760_v57, %v72_v63 }
  0x65   :  { %v354_v32 = vand.u32 2147483647, %v353_v22 }
  0x66   :  { %v216_v12 = vadd.f32 1.0, %v215_v10  ;;  %v223_v13 = vadd.f32 1.0, %v222_v11 }
  0x67   :  { %v357_v38 = vmul.f32 %v356_v18, %v354_v32 }
  0x68   :  { %v224_v20 = vmul.f32 %v223_v13, %v208_v45  ;;  %v232_v19 = vxor.u32 2147483648, %v216_v12  ;;  %v360_v45 = vsub.s32 4, %v741_v34 }
  0x69   :  { %v358_v2 = vxor.u32 2147483648, %v357_v38 }
  0x6a   :  { %v229_v26 = vxor.u32 2147483648, %v224_v20  ;;  %v233_v28 = vsel %vm231_vm12, %v232_v19, %v224_v20  ;;  %v361_v53 = vsel %vm238_vm0, %v360_v45, %v741_v34  ;;  %v76_v34 = vand.u32 2147483648, %v760_v57 }
  0x6b   :  { %v359_v44 = vsel %vm238_vm0, %v358_v2, %v357_v38  ;;  %v363_v56 = vsel %vm784_vm1, 0, %v361_v53 }
  0x6c   :  { %v230_v59 = vsel %vm228_vm13, %v216_v12, %v229_v26  ;;  %v362_v46 = vsel %vm784_vm1, %v608_v3, %v359_v44  ;;  %v380_v39 = vand.u32 3, %v363_v56  ;;  %v77_v9 = vsel %vm75_vm4, %v76_v34, %v74_v25 }
  0x6d   :  { %v234_v36 = vsel %vm227_vm14, %v230_v59, %v233_v28  ;;  %v364_v47 = vmul.f32 %v362_v46, %v362_v46 }
  0x6e   :  { %v235_v40 = vsel %vm225_vm15, nan, %v234_v36  ;;  %vm385_vm3 = vcmp.eq.s32.totalorder %v380_v39, 2  ;;  %vm382_vm5 = vcmp.eq.s32.totalorder %v380_v39, 0  ;;  %vm381_vm6 = vcmp.lt.s32.totalorder %v380_v39, 2 }
  0x6f   :  { %v390_v42 = vmul.f32 %v235_v40, %v65_v33  ;;  %v365_v7 = vmul.f32 -0.001358992, %v364_v47  ;;  %v372_v48 = vmul.f32 -0.00019511016, %v364_v47 }
  0x71   :  { %392 = vst [vmem:[#allocation7] sm:$0xff] %v390_v42  ;;  %v366_v15 = vadd.f32 0.041655596, %v365_v7  ;;  %v373_v54 = vadd.f32 0.008332121, %v372_v48 }
  0x73   :  { %v367_v58 = vmul.f32 %v366_v15, %v364_v47  ;;  %v374_v60 = vmul.f32 %v373_v54, %v364_v47 }
  0x75   :  { %v368_v29 = vadd.f32 -0.4999988, %v367_v58  ;;  %v375_v37 = vadd.f32 -0.16666654, %v374_v60 }
  0x77   :  { %v369_v62 = vmul.f32 %v368_v29, %v364_v47  ;;  %v376_v35 = vmul.f32 %v375_v37, %v364_v47 }
  0x79   :  { %v370_v21 = vadd.f32 1.0, %v369_v62  ;;  %v377_v55 = vadd.f32 1.0, %v376_v35 }
  0x7b   :  { %v378_v0 = vmul.f32 %v377_v55, %v362_v46  ;;  %v386_v24 = vxor.u32 2147483648, %v370_v21 }
  0x7d   :  { %v383_v4 = vxor.u32 2147483648, %v378_v0  ;;  %v387_v8 = vsel %vm385_vm3, %v386_v24, %v378_v0 }
  0x7f   :  { %v384_v30 = vsel %vm382_vm5, %v370_v21, %v383_v4 }
  0x80   :  { %v388_v10 = vsel %vm381_vm6, %v384_v30, %v387_v8 }
  0x81   :  { %v389_v11 = vsel %vm379_vm7, nan, %v388_v10 }
  0x82   :  { %v391_v23 = vmul.f32 %v389_v11, %v77_v9 }
  0x84   :  { %393 = vst [vmem:[#allocation7 + $0x8] sm:$0xff] %v391_v23 }
  0x85   :  { %409 = dma.vmem_to_hbm [thread:$0]  %s405_s4, 256, %s407_s6, [#allocation4]  }
  0x86   :  { %560 = dma.done.wait [#allocation4], 256  }
  0x87   :  { %561 = vsyncadd [#allocation4], 4294967040 }
  0x88   :  { %562 = dma.done.wait [#allocation9], 16  }
  0x89   :  { %563 = vsyncadd [#allocation9], 4294967280 }
  0x8a   :  { %429 = vsyncpa [#allocation3], 1 }
  0x8b   :  { %430 = vsyncpa [#allocation6], 1 }
  0x8c   :  { %431 = vsyncpa [#allocation4], 1 }
  0x8d   :  { %432 = vsyncpa [#allocation9], 1 }

</bundles_post_ra>
